<compile_context>
chip_gen: v7x
topology: tpu7x:2x2x1
jax: 0.10.0
libtpu: 0.0.40
codegen_flags: <defaults>
</compile_context>

<pallas_src>
import math
import functools

import jax
import jax.numpy as jnp
from jax import lax
from jax.experimental import pallas as pl
from jax.experimental.pallas import tpu as pltpu


def _abgp_kernel(gamma_ref, x_ref, wqt_ref, bq_ref, o_ref, *, alpha, dim):
    """One grid step: x block (TB, C, HW) -> output block (TB, C)."""
    TB, C, HW = x_ref.shape
    gamma = jnp.clip(gamma_ref[0], 1e-7, 100.0)          # scalar from SMEM
    inv_gamma = 1.0 / gamma
    inv_sqrt_d = 1.0 / math.sqrt(dim)

    xf = x_ref[...]                                              # (TB, C, HW)

    # ---- GeM pooling (eq. 9 inner), vectorized over the whole block --------
    # x^gamma via EUP exp/log; HW mean = lane-axis reduction (XLU slot).
    x_pow = jnp.exp(gamma * jnp.log(jnp.maximum(xf, 1e-7)))      # (TB, C, HW)
    pooled = jnp.sum(x_pow, axis=-1) * (1.0 / HW)                # (TB, C)
    pooled = jnp.exp(jnp.log(pooled) * inv_gamma)                # ^(1/gamma)

    # ---- query projection: pooled @ Wq^T + b --------------------------------
    # Wq pre-transposed in the wrapper -> MXU-native ((1,),(0,)) contraction.
    dq = lax.dot_general(pooled, wqt_ref[...], (((1,), (0,)), ((), ())),
                         preferred_element_type=jnp.float32) + bq_ref[...]
    dq = dq * inv_sqrt_d                      # fold 1/sqrt(d) into the query

    # ---- attention over spatial positions (eq. 10), batched over TB --------
    dq3 = dq[:, None, :]                                          # (TB, 1, C)
    scores = jnp.einsum('tqc,tch->tqh', dq3, xf,
                        preferred_element_type=jnp.float32)       # (TB, 1, HW)
    m = jnp.max(scores, axis=-1, keepdims=True)
    e = jnp.exp(scores - m)                                       # (TB, 1, HW)
    denom = jnp.sum(e, axis=-1, keepdims=True)                    # (TB, 1, 1)

    # weighted sum of V (= x) (eq. 12), one batched MXU contraction over HW;
    # softmax normalization deferred.
    w = jnp.einsum('tqh,tch->tqc', e, xf,
                   preferred_element_type=jnp.float32)[:, 0, :]   # (TB, C)
    denom2 = denom[:, 0, :]                                       # (TB, 1)

    # ---- f_alpha^{-1} + L2 normalize, batched over TB -----------------------
    if alpha == 1.0:
        # exact divide: an approx-reciprocal scale error would NOT cancel
        # through exp() followed by the L2 norm on this path.
        out = jnp.exp(w / denom2)
    else:
        # uniform per-row scale error of the approx reciprocal cancels in the
        # final per-row L2 normalization for the power-law path.
        w = w * pl.reciprocal(denom2, approx=True)
        if float(alpha).is_integer():
            out = w ** int(alpha)               # exact for negative bases
        else:
            out = jnp.exp(alpha * jnp.log(jnp.maximum(w, 1e-30)))

    # F.normalize(p=2, dim=1, eps=1e-12)  ==  out * rsqrt(max(ssq, 1e-24))
    ssq = jnp.sum(out * out, axis=-1, keepdims=True)              # (TB, 1)
    o_ref[...] = out * lax.rsqrt(jnp.maximum(ssq, 1e-24))


def _vmem_params():
    """Generation-aware VMEM sizing: (physical, vmem_limit_bytes, budget).

    v5e/v6e: 128 MiB physical -> ~96 MiB limit / 48 MiB working-set budget.
    v7x    :  64 MiB per TC   -> ~48 MiB limit / 24 MiB budget.
    """
    try:
        phys = int(pltpu.get_tpu_info().vmem_capacity_bytes)
    except Exception:
        phys = 64 << 20                       # conservative default (v7x-sized)
    limit = min(int(phys * 3 // 4), 96 << 20)
    return phys, limit, limit // 2


def _pick_batch_block(B, C, HW, budget_bytes, *, cap=256, prefer_steps=1):
    """Pick TB: multiple of 8 (sublane-aligned unmasked output stores) or the
    whole (small) batch; largest candidate whose working set fits the budget
    while keeping at least `prefer_steps` grid steps."""
    def need(tb):
        # double-buffered x block + x_pow intermediate + per-row temporaries
        # + replicated (double-buffered) weights.
        return (3 * tb * C * HW + 8 * tb * C + 2 * tb * HW
                + 2 * (C * C + 2 * C)) * 4

    if B <= 8:
        return B                              # tiny batch: one grid step
    best = 8
    tb = 16
    while tb <= min(B, cap):
        if need(tb) <= budget_bytes and -(-B // tb) >= prefer_steps:
            best = tb
        tb += 8
    return best


def attention_based_global_pooling(x, gamma, wq, bq, *, alpha=2.0):
    """x: (B, C, H, W) float32 NCHW.  Returns (B, C) float32."""
    B, C, H, W = x.shape
    HW = H * W
    x_chw = x.reshape(B, C, HW).astype(jnp.float32)   # free reshape, no transpose
    wqt = jnp.asarray(wq, jnp.float32).T              # one-time XLA transpose
    bq2 = jnp.asarray(bq, jnp.float32).reshape(1, C)
    gamma_arr = jnp.reshape(gamma, (1,)).astype(jnp.float32)

    phys, vmem_limit, budget = _vmem_params()
    # v7x heuristic: 2 TensorCores share the "parallel" batch axis, so keep
    # the grid at >= 2 steps when the batch allows it.
    prefer_steps = 2 if (phys <= (64 << 20) and B >= 16) else 1
    TB = _pick_batch_block(B, C, HW, budget, prefer_steps=prefer_steps)

    steps = -(-B // TB)
    B_pad = steps * TB
    if B_pad != B:
        # Pad batch (zeros are safe: clamps keep every op finite; rows dropped below).
        x_chw = jnp.pad(x_chw, ((0, B_pad - B), (0, 0), (0, 0)))

    kernel = functools.partial(_abgp_kernel, alpha=float(alpha), dim=C)
    out = pl.pallas_call(
        kernel,
        grid=(steps,),
        in_specs=[
            pl.BlockSpec(memory_space=pltpu.MemorySpace.SMEM),      # gamma (1,)
            pl.BlockSpec((TB, C, HW), lambda b: (b, 0, 0)),         # x batch block
            pl.BlockSpec((C, C), lambda b: (0, 0)),                 # Wq^T (replicated)
            pl.BlockSpec((1, C), lambda b: (0, 0)),                 # bias (replicated)
        ],
        out_specs=pl.BlockSpec((TB, C), lambda b: (b, 0)),
        out_shape=jax.ShapeDtypeStruct((B_pad, C), jnp.float32),
        compiler_params=pltpu.CompilerParams(
            dimension_semantics=("parallel",),   # batch blocks independent
            vmem_limit_bytes=vmem_limit),
    )(gamma_arr, x_chw, wqt, bq2)
    return out[:B] if B_pad != B else out


def _reference(x, gamma, wq, bq, *, alpha=2.0):
    """Pure-JAX reference mirroring the PyTorch forward."""
    B, C, H, W = x.shape
    g = jnp.clip(gamma, 1e-7, 100.0)
    x_cl = jnp.maximum(x, 1e-7)
    pooled = jnp.mean(jnp.exp(g * jnp.log(x_cl)), axis=(2, 3))
    pooled = jnp.exp(jnp.log(pooled) / g)                        # (B, C)
    dq = pooled @ wq.T + bq                                      # (B, C)
    x_flat = jnp.transpose(x.reshape(B, C, H * W), (0, 2, 1))    # (B, HW, C)
    scores = jnp.einsum("bnc,bc->bn", x_flat, dq) / math.sqrt(C)
    attn = jax.nn.softmax(scores, axis=-1)
    wf = jnp.einsum("bn,bnc->bc", attn, x_flat)
    if alpha == 1.0:
        out = jnp.exp(wf)
    elif float(alpha).is_integer():
        out = wf ** int(alpha)
    else:
        out = jnp.exp(alpha * jnp.log(jnp.maximum(wf, 1e-30)))
    norm = jnp.maximum(jnp.sqrt(jnp.sum(out * out, axis=1, keepdims=True)), 1e-12)
    return out / norm


if __name__ == "__main__":
    B, C, H, W = 2, 8, 16, 16
    ALPHA = 2.0

    key = jax.random.PRNGKey(0)
    kx, kw, kb = jax.random.split(key, 3)

    x = jax.random.normal(kx, (B, C, H, W), dtype=jnp.float32)
    gamma = jnp.float32(2.0)                                              # nn.Parameter scalar
    wq = jax.random.normal(kw, (C, C), dtype=jnp.float32) / math.sqrt(C)  # query_proj.weight
    bq = jax.random.normal(kb, (C,), dtype=jnp.float32) * 0.1             # query_proj.bias
    # NOTE: self.attention_weights is defined in __init__ but never used in forward.

    out = attention_based_global_pooling(x, gamma, wq, bq, alpha=ALPHA)
    out = jax.block_until_ready(out)

    ref = jax.block_until_ready(_reference(x, gamma, wq, bq, alpha=ALPHA))
    assert out.shape == (B, C)
    assert jnp.allclose(out, ref, atol=1e-4, rtol=1e-4), (out, ref)

    print("KERNEL_OK")
</pallas_src>

<mosaic_0001>
module attributes {stable_mosaic.version = 11 : i64} {
  func.func @_abgp_kernel(%arg0: i32, %arg1: memref<1xf32, #tpu.memory_space<smem>>, %arg2: memref<2x8x256xf32, #tpu.memory_space<vmem>>, %arg3: memref<8x8xf32, #tpu.memory_space<vmem>>, %arg4: memref<1x8xf32, #tpu.memory_space<vmem>>, %arg5: memref<2x8xf32, #tpu.memory_space<vmem>>) attributes {dimension_semantics = [#tpu.dimension_semantics<parallel>], iteration_bounds = array<i64: 1>, scalar_prefetch = 0 : i64, scratch_operands = 0 : i64, tpu.core_type = #tpu.core_type<tc>, window_params = [{transform_indices = @transform_0, window_bounds = array<i64: 1>}, {transform_indices = @transform_1, window_bounds = array<i64: 2, 8, 256>}, {pipeline_mode = #tpu.pipeline_mode<synchronous>, transform_indices = @transform_2, window_bounds = array<i64: 8, 8>}, {pipeline_mode = #tpu.pipeline_mode<synchronous>, transform_indices = @transform_3, window_bounds = array<i64: 1, 8>}, {transform_indices = @transform_4, window_bounds = array<i64: 2, 8>}]} {
    %c0 = arith.constant 0 : index
    %0 = memref.load %arg1[%c0] : memref<1xf32, #tpu.memory_space<smem>>
    %cst = arith.constant 1.000000e-07 : f32
    %cst_0 = arith.constant 1.000000e+02 : f32
    %1 = arith.maximumf %cst, %0 : f32
    %2 = arith.minimumf %cst_0, %1 : f32
    %cst_1 = arith.constant 1.000000e+00 : f32
    %3 = arith.divf %cst_1, %2 : f32
    %c0_2 = arith.constant 0 : index
    %c0_3 = arith.constant 0 : index
    %c0_4 = arith.constant 0 : index
    %4 = vector.load %arg2[%c0_2, %c0_3, %c0_4] : memref<2x8x256xf32, #tpu.memory_space<vmem>>, vector<2x8x256xf32>
    %cst_5 = arith.constant 1.000000e-07 : f32
    %5 = vector.broadcast %cst_5 : f32 to vector<2x8x256xf32>
    %6 = arith.maximumf %4, %5 : vector<2x8x256xf32>
    %7 = math.log %6 : vector<2x8x256xf32>
    %8 = vector.broadcast %2 : f32 to vector<2x8x256xf32>
    %9 = arith.mulf %8, %7 : vector<2x8x256xf32>
    %10 = math.exp %9 : vector<2x8x256xf32>
    %cst_6 = arith.constant dense<0.000000e+00> : vector<2x8xf32>
    %11 = vector.multi_reduction <add>, %10, %cst_6 [2] : vector<2x8x256xf32> to vector<2x8xf32>
    %cst_7 = arith.constant 3.906250e-03 : f32
    %12 = vector.broadcast %cst_7 : f32 to vector<2x8xf32>
    %13 = arith.mulf %11, %12 : vector<2x8xf32>
    %14 = math.log %13 : vector<2x8xf32>
    %15 = vector.broadcast %3 : f32 to vector<2x8xf32>
    %16 = arith.mulf %14, %15 : vector<2x8xf32>
    %17 = math.exp %16 : vector<2x8xf32>
    %c0_8 = arith.constant 0 : index
    %c0_9 = arith.constant 0 : index
    %18 = vector.load %arg3[%c0_8, %c0_9] : memref<8x8xf32, #tpu.memory_space<vmem>>, vector<8x8xf32>
    %cst_10 = arith.constant dense<0.000000e+00> : vector<2x8xf32>
    %19 = tpu.matmul %17, %18, %cst_10 {dimension_numbers = #tpu.dot_dimension_numbers<[1], [0], [0], [1], [0, 0, 1, 1], [], []>} : vector<2x8xf32>, vector<8x8xf32>, vector<2x8xf32> -> vector<2x8xf32>
    %c0_11 = arith.constant 0 : index
    %c0_12 = arith.constant 0 : index
    %20 = vector.load %arg4[%c0_11, %c0_12] : memref<1x8xf32, #tpu.memory_space<vmem>>, vector<1x8xf32>
    %21 = vector.broadcast %20 : vector<1x8xf32> to vector<2x8xf32>
    %22 = arith.addf %19, %21 : vector<2x8xf32>
    %cst_13 = arith.constant 0.353553385 : f32
    %23 = vector.broadcast %cst_13 : f32 to vector<2x8xf32>
    %24 = arith.mulf %22, %23 : vector<2x8xf32>
    %25 = vector.shape_cast %24 : vector<2x8xf32> to vector<2x1x8xf32>
    "tpu.trace_start"() <{level = 10 : i32, message = "tqc,tch->tqh"}> : () -> ()
    %cst_14 = arith.constant dense<0.000000e+00> : vector<2x1x256xf32>
    %26 = tpu.matmul %25, %4, %cst_14 {dimension_numbers = #tpu.dot_dimension_numbers<[2], [1], [1], [2], [0, 0, 0, 1, 1, 2], [0], [0]>} : vector<2x1x8xf32>, vector<2x8x256xf32>, vector<2x1x256xf32> -> vector<2x1x256xf32>
    "tpu.trace_stop"() : () -> ()
    %cst_15 = arith.constant dense<0xFF800000> : vector<2x1xf32>
    %27 = vector.multi_reduction <maximumf>, %26, %cst_15 [2] : vector<2x1x256xf32> to vector<2x1xf32>
    %28 = vector.shape_cast %27 : vector<2x1xf32> to vector<2x1x1xf32>
    %29 = vector.broadcast %28 : vector<2x1x1xf32> to vector<2x1x256xf32>
    %30 = arith.subf %26, %29 : vector<2x1x256xf32>
    %31 = math.exp %30 : vector<2x1x256xf32>
    %cst_16 = arith.constant dense<0.000000e+00> : vector<2x1xf32>
    %32 = vector.multi_reduction <add>, %31, %cst_16 [2] : vector<2x1x256xf32> to vector<2x1xf32>
    %33 = vector.shape_cast %32 : vector<2x1xf32> to vector<2x1x1xf32>
    "tpu.trace_start"() <{level = 10 : i32, message = "tqh,tch->tqc"}> : () -> ()
    %cst_17 = arith.constant dense<0.000000e+00> : vector<2x1x8xf32>
    %34 = tpu.matmul %31, %4, %cst_17 {dimension_numbers = #tpu.dot_dimension_numbers<[2], [2], [1], [1], [0, 0, 0, 1, 1, 1], [0], [0]>} : vector<2x1x256xf32>, vector<2x8x256xf32>, vector<2x1x8xf32> -> vector<2x1x8xf32>
    "tpu.trace_stop"() : () -> ()
    %35 = vector.shape_cast %34 : vector<2x1x8xf32> to vector<2x8xf32>
    %36 = vector.shape_cast %33 : vector<2x1x1xf32> to vector<2x1xf32>
    %37 = tpu.reciprocal %36 {approx = true} : vector<2x1xf32> -> vector<2x1xf32>
    %38 = vector.broadcast %37 : vector<2x1xf32> to vector<2x8xf32>
    %39 = arith.mulf %35, %38 : vector<2x8xf32>
    %40 = arith.mulf %39, %39 : vector<2x8xf32>
    %41 = arith.mulf %40, %40 : vector<2x8xf32>
    %cst_18 = arith.constant dense<0.000000e+00> : vector<2xf32>
    %42 = vector.multi_reduction <add>, %41, %cst_18 [1] : vector<2x8xf32> to vector<2xf32>
    %43 = vector.shape_cast %42 : vector<2xf32> to vector<2x1xf32>
    %cst_19 = arith.constant 1.000000e-24 : f32
    %44 = vector.broadcast %cst_19 : f32 to vector<2x1xf32>
    %45 = arith.maximumf %43, %44 : vector<2x1xf32>
    %46 = math.rsqrt %45 : vector<2x1xf32>
    %47 = vector.broadcast %46 : vector<2x1xf32> to vector<2x8xf32>
    %48 = arith.mulf %40, %47 : vector<2x8xf32>
    %c0_20 = arith.constant 0 : index
    %c0_21 = arith.constant 0 : index
    %49 = vector.load %arg5[%c0_20, %c0_21] : memref<2x8xf32, #tpu.memory_space<vmem>>, vector<2x8xf32>
    tpu.vector_store %arg5[%c0_20, %c0_21], %48 {strides = array<i32>} : memref<2x8xf32, #tpu.memory_space<vmem>>, vector<2x8xf32>,
    return
  }
  func.func @transform_0(%arg0: i32) -> i32 {
    %c0_i32 = arith.constant 0 : i32
    %c0_i32_0 = arith.constant 0 : i32
    return %c0_i32 : i32
  }
  func.func @transform_1(%arg0: i32) -> (i32, i32, i32) {
    %c0_i32 = arith.constant 0 : i32
    %c0_i32_0 = arith.constant 0 : i32
    %c0_i32_1 = arith.constant 0 : i32
    return %arg0, %c0_i32, %c0_i32_0 : i32, i32, i32
  }
  func.func @transform_2(%arg0: i32) -> (i32, i32) {
    %c0_i32 = arith.constant 0 : i32
    %c0_i32_0 = arith.constant 0 : i32
    %c0_i32_1 = arith.constant 0 : i32
    return %c0_i32, %c0_i32_0 : i32, i32
  }
  func.func @transform_3(%arg0: i32) -> (i32, i32) {
    %c0_i32 = arith.constant 0 : i32
    %c0_i32_0 = arith.constant 0 : i32
    %c0_i32_1 = arith.constant 0 : i32
    return %c0_i32, %c0_i32_0 : i32, i32
  }
  func.func @transform_4(%arg0: i32) -> (i32, i32) {
    %c0_i32 = arith.constant 0 : i32
    %c0_i32_0 = arith.constant 0 : i32
    return %arg0, %c0_i32 : i32, i32
  }
}

</mosaic_0001>

<bundles_post_ra>
// kernel: tpu_custom_call.1
= control target key start
LH: loop header
LB: loop body
LE: loop exit
PB: predicated region body
PF: predicated region fallthrough
CT: control target
= control target key end

     0   :  { %10 = vsyncpa [#allocation4], 0  ;;  %s840_s0 = inlined_call_operand.<no memory space> [shape: f32[1], index: 0, kind: input, shape index: {}]   ;;  %s841_s1 = inlined_call_operand.hbm [shape: f32[2,8,256], index: 1, kind: input, shape index: {}]   ;;  %s842_s2 = inlined_call_operand.hbm [shape: f32[8,8], index: 2, kind: input, shape index: {}]   ;;  %s843_s3 = inlined_call_operand.vmem [shape: f32[1,8], index: 3, kind: input, shape index: {}]   ;;  %s844_s4 = inlined_call_operand.hbm [shape: f32[2,8], index: 4, kind: output, shape index: {}]  }
   0x1   :  { %11 = vsyncpa [#allocation7], 0 }
   0x2   :  { %12 = vsyncpa [#allocation5], 0  ;;  %s727_s15 = smov [#allocation3]   ;;  %s655_s19 = scalar_lea.hbm %s841_s1, 512 }
   0x3   :  { %s20_s16 = sshll.u32 %s727_s15, 4  ;;  %p656_p0 = scmp.ne.s32.totalorder %s841_s1, %s655_s19  ;;  %s21_s16 = int_to_ptr.vmem [resolvable:$true] %s20_s16 }
   0x4   :  { %p659_p1 = scmp.lt.u32.totalorder %s655_s19, %s841_s1 }
   0x6   :  { %p661_p2 = pnand %p659_p1, %p656_p0 }
   0x8   :  { %664 = shalt.err (!%p661_p2)
}
   0x9   :  { %s665_s24 = scalar_lea.vmem %s21_s16, 512  ;;  %p670_p4 = scmp.lt.s32.totalorder %s21_s16, %s21_s16 }
   0xa   :  { %p666_p3 = scmp.ne.s32.totalorder %s21_s16, %s665_s24  ;;  %p671_p5 = scmp.lt.s32.totalorder %s665_s24, %s665_s24 }
   0xc   :  { %p672_p6 = por %p671_p5, %p670_p4 }
   0xe   :  { %p673_p7 = pnand %p672_p6, %p666_p3 }
  0x10   :  { %676 = shalt.err (!%p673_p7)
}
  0x11   :  { %s728_s25 = smov 256   ;;  %s729_s26 = smov 16  }
  0x12   :  { %26 = dma.hbm_to_vmem [thread:$0]  %s841_s1, 512, %s21_s16, [#allocation4], %s728_s25, %s728_s25, %s729_s26  }
  0x13   :  { %s730_s29 = smov [#allocation6]   ;;  %s677_s7 = scalar_lea.hbm %s842_s2, 128 }
  0x14   :  { %s33_s30 = sshll.u32 %s730_s29, 4  ;;  %p678_p8 = scmp.ne.s32.totalorder %s842_s2, %s677_s7  ;;  %s34_s30 = int_to_ptr.vmem [resolvable:$true] %s33_s30 }
  0x15   :  { %p681_p9 = scmp.lt.u32.totalorder %s677_s7, %s842_s2 }
  0x17   :  { %p683_p10 = pnand %p681_p9, %p678_p8 }
  0x19   :  { %686 = shalt.err (!%p683_p10)
}
  0x1a   :  { %s687_s12 = scalar_lea.vmem %s34_s30, 128  ;;  %p692_p12 = scmp.lt.s32.totalorder %s34_s30, %s34_s30 }
  0x1b   :  { %p688_p11 = scmp.ne.s32.totalorder %s34_s30, %s687_s12  ;;  %p693_p13 = scmp.lt.s32.totalorder %s687_s12, %s687_s12 }
  0x1d   :  { %p694_p0 = por %p693_p13, %p692_p12 }
  0x1f   :  { %p695_p1 = pnand %p694_p0, %p688_p11 }
  0x21   :  { %698 = shalt.err (!%p695_p1)
}
  0x22   :  { %36 = dma.hbm_to_vmem [thread:$0]  %s842_s2, 128, %s34_s30, [#allocation7]  }
  0x23   :  { %721 = dma.done.wait [#allocation4], 512  }
  0x24   :  { %722 = vsyncadd [#allocation4], 4294966784 }
  0x25   :  { %723 = dma.done.wait [#allocation7], 128  }
  0x26   :  { %724 = vsyncadd [#allocation7], 4294967168  ;;  %s731_s14 = smov 1e-07   ;;  %s732_s18 = smov 100.0   ;;  %v789_v1 = vld [vmem:[#allocation3] sm:$0xff]  ;;  %v109_v47 = vlaneseq }
  0x27   :  { %s46_s17 = smax.f32 %s731_s14, %s840_s0  ;;  %v52_v2 = vld [vmem:[#allocation3 + $0x8] sm:$0xff]  ;;  %v791_v3 = vld [vmem:[#allocation3 + $0x10] sm:$0xff]  ;;  %v55_v4 = vmax.f32 %v789_v1, 1e-07  ;;  %v794_v6 = vld [vmem:[#allocation3 + $0x18] sm:$0xff]  ;;  %v733_v33 = vmov 0.0  }
  0x28   :  { %s47_s19 = smin.f32 %s732_s18, %s46_s17  ;;  %v56_v5 = vmax.f32 %v52_v2, 1e-07  ;;  %220 = vmatprep.subr.mxu1 %v52_v2  ;;  %v57_v7 = vmax.f32 %v791_v3, 1e-07  ;;  %v58_v8 = vmax.f32 %v794_v6, 1e-07  ;;  %598 = vmatprep.subr.mxu0 %v733_v33 }
  0x29   :  { %v48_v0 = vstv %s47_s19  ;;  %221 = vmatpush1.msra.mxu1 %v789_v1  ;;  %v99_v32 = vld [vmem:[#allocation6] sm:$0xff]  ;;  %vm734_vm0 = vmmov 0   ;;  %284 = vmatprep.mubr.f32.mxu1 %v733_v33  ;;  %v110_v48 = vand.u32 127, %v109_v47  ;;  %v800_v49 = vshrl.u32 %v109_v47, 7 }
  0x2a   :  { %615 = vrcp.f32 %v48_v0  ;;  %397 = vmatprep.subr.mxu1 %v52_v2  ;;  %600 = vmatprep.mubr.msk.f32.mxu0 %vm734_vm0, %v733_v33  ;;  %vm119_vm1 = vcmask 1041409   ;;  %vm121_vm2 = vcmask 64512   ;;  %v735_v56 = vmov 1966171168   ;;  %v592_v59 = vld [vmem:[%s843_s3] ss:$0 sm:$0xff] }
  0x2b   :  { %617 = vlog2.f32 %v55_v4  ;;  %599 = vmatpush3.msra.mxu0 %v99_v32  ;;  %v113_v50 = vsub.s32 %v110_v48, %v800_v49  ;;  %v197_v57 = vunpack.c.l.s4 %v735_v56  ;;  %vm364_vm3 = vcmask 1040384   ;;  %s736_s3 = smov [#allocation8]  }
  0x2c   :  { %619 = vlog2.f32 %v56_v5  ;;  %293 = vmatprep.subr.mxu0 %v794_v6  ;;  %vm558_vm4 = vcmask 58368   ;;  %s582_s21 = sshll.u32 %s736_s3, 4  ;;  %s583_s21 = int_to_ptr.vmem [resolvable:$true] %s582_s21 }
  0x2d   :  { %621 = vlog2.f32 %v57_v7  ;;  %v198_v58 = vunpack.c.0.s8 %v197_v57  ;;  %s699_s22 = scalar_lea.vmem %s583_s21, 32  ;;  %p704_p3 = scmp.lt.s32.totalorder %s583_s21, %s583_s21 }
  0x2e   :  { %623 = vlog2.f32 %v58_v8  ;;  %p700_p2 = scmp.ne.s32.totalorder %s583_s21, %s699_s22  ;;  %p705_p4 = scmp.lt.s32.totalorder %s699_s22, %s699_s22 }
  0x2f   :  { %v201_v62 = vsub.s32 %v198_v58, %v800_v49 }
  0x30   :  { %p706_p5 = por %p705_p4, %p704_p3 }
  0x32   :  { %p707_p6 = pnand %p706_p5, %p700_p2 }
  0x34   :  { %v616_v9 = vpop.eup %615 }
  0x35   :  { %603 = vpush %v616_v9  ;;  %v618_v10 = vpop.eup %617 }
  0x36   :  { %v620_v11 = vpop.eup %619  ;;  %v60_v12 = vmul.f32 0.6931472, %v618_v10 }
  0x37   :  { %v622_v13 = vpop.eup %621  ;;  %v62_v14 = vmul.f32 0.6931472, %v620_v11 }
  0x38   :  { %v624_v15 = vpop.eup %623  ;;  %v68_v16 = vmul.f32 %v60_v12, %v48_v0  ;;  %v64_v17 = vmul.f32 0.6931472, %v622_v13 }
  0x39   :  { %v69_v18 = vmul.f32 %v62_v14, %v48_v0  ;;  %v66_v19 = vmul.f32 0.6931472, %v624_v15 }
  0x3a   :  { %v72_v20 = vmul.f32 1.442695, %v68_v16  ;;  %v70_v21 = vmul.f32 %v64_v17, %v48_v0 }
  0x3b   :  { %v74_v22 = vmul.f32 1.442695, %v69_v18  ;;  %v71_v23 = vmul.f32 %v66_v19, %v48_v0 }
  0x3c   :  { %625 = vpow2.f32 %v72_v20  ;;  %v76_v24 = vmul.f32 1.442695, %v70_v21 }
  0x3d   :  { %627 = vpow2.f32 %v74_v22  ;;  %v78_v25 = vmul.f32 1.442695, %v71_v23 }
  0x3e   :  { %629 = vpow2.f32 %v76_v24 }
  0x3f   :  { %631 = vpow2.f32 %v78_v25 }
  0x46   :  { %v626_v26 = vpop.eup %625 }
  0x47   :  { %v628_v27 = vpop.eup %627 }
  0x48   :  { %v630_v28 = vpop.eup %629  ;;  %v80_v29 = vadd.f32 %v628_v27, %v626_v26 }
  0x49   :  { %v632_v30 = vpop.eup %631 }
  0x4a   :  { %81 = vadd.xlane.f32.xlu0 %v80_v29  ;;  %v83_v31 = vadd.f32 %v632_v30, %v630_v28 }
  0x4e   :  { %84 = vadd.xlane.f32.xlu0 %v83_v31 }
  0x66   :  { %s604_s0 = spop %603 }
  0x67   :  { %v92_v39 = vstv %s604_s0 }
  0xd7   :  { %v82_v34 = vpop.xlane.xlu0 %81 }
  0xd8   :  { %v86_v35 = vmul.f32 0.00390625, %v82_v34 }
  0xda   :  { %633 = vlog2.f32 %v86_v35 }
  0xdb   :  { %v85_v36 = vpop.xlane.xlu0 %84 }
  0xdc   :  { %v87_v37 = vmul.f32 0.00390625, %v85_v36 }
  0xde   :  { %635 = vlog2.f32 %v87_v37  ;;  %v541_v37 = vsub.s32 0, %v800_v49 }
  0xe4   :  { %v634_v38 = vpop.eup %633 }
  0xe5   :  { %v89_v40 = vmul.f32 0.6931472, %v634_v38 }
  0xe7   :  { %v93_v41 = vmul.f32 %v92_v39, %v89_v40 }
  0xe8   :  { %v636_v42 = vpop.eup %635 }
  0xe9   :  { %v91_v43 = vmul.f32 0.6931472, %v636_v42  ;;  %v95_v44 = vmul.f32 1.442695, %v93_v41 }
  0xeb   :  { %v94_v45 = vmul.f32 %v92_v39, %v91_v43  ;;  %637 = vpow2.f32 %v95_v44 }
  0xed   :  { %v97_v46 = vmul.f32 1.442695, %v94_v45 }
  0xef   :  { %639 = vpow2.f32 %v97_v46 }
  0xf5   :  { %v638_v51 = vpop.eup %637 }
  0xf6   :  { %v114_v53 = vrot.slane %v638_v51, %v113_v50 }
  0xf9   :  { %v640_v52 = vpop.eup %639 }
  0xfa   :  { %v118_v54 = vrot.slane %v640_v52, %v113_v50 }
  0xfc   :  { %v120_v55 = vsel %vm119_vm1, %v118_v54, %v114_v53 }
  0xfd   :  { %601 = vmatmul.mubr.msk.f32.vlgmr.msra.gmra.mrb[0].mxu0 %vm121_vm2, %v120_v55 }
  0xfe   :  { %294 = vmatpush1.msra.mxu0 %v791_v3  ;;  %357 = vmatprep.mubr.f32.mxu0 %v733_v33 }
  0xff   :  { %467 = vmatprep.subr.mxu0 %v794_v6 }
 0x1d0   :  { %v190_v60 = vpop.f32.mrb[0].mxu0 }
 0x1d1   :  { %v191_v61 = vadd.f32 %v592_v59, %v190_v60  ;;  %v602_v63 = vpop.f32.mrb[1].mxu0 }
 0x1d3   :  { %v194_v0 = vmul.f32 0.35355338, %v191_v61 }
 0x1d5   :  { %v202_v2 = vrot.slane %v194_v0, %v201_v62 }
 0x1d7   :  { %v203_v4 = vcombine.high %v202_v2, %v202_v2  ;;  %v210_v5 = vrot.slane %v202_v2, %v201_v62 }
 0x1d9   :  { %v217_v7 = vrot.slane %v203_v4, %v201_v62  ;;  %594 = vmatmul.mubr.msk.f32.vlgmr.msra.gmra.mrb[0].mxu1 %vm121_vm2, %v210_v5 }
 0x1da   :  { %398 = vmatpush1.xpose.msra.mxu1 %v789_v1 }
 0x1db   :  { %595 = vmatmul.mubr.msk.f32.vlgmr.msra.gmra.mrb[2].mxu0 %vm121_vm2, %v217_v7 }
 0x1dc   :  { %468 = vmatpush1.xpose.msra.mxu0 %v791_v3 }
 0x2ac   :  { %v286_v6 = vpop.f32.mrb[0].mxu1 }
 0x2ad   :  { %v365_v8 = vsel %vm364_vm3, %v286_v6, -inf  ;;  %v288_v9 = vpop.f32.mrb[1].mxu1 }
 0x2ae   :  { %v366_v10 = vsel %vm364_vm3, %v288_v9, -inf  ;;  %v359_v11 = vpop.f32.mrb[2].mxu0 }
 0x2af   :  { %v361_v12 = vpop.f32.mrb[3].mxu0  ;;  %v370_v13 = vsel %vm364_vm3, %v359_v11, -inf  ;;  %v367_v14 = vmax.f32 %v365_v8, %v366_v10 }
 0x2b0   :  { %v371_v15 = vsel %vm364_vm3, %v361_v12, -inf }
 0x2b1   :  { %v372_v16 = vmax.f32 %v370_v13, %v371_v15 }
 0x2b3   :  { %373 = vmax.xlane.f32.xlu1 %v372_v16 }
 0x2b7   :  { %368 = vmax.xlane.f32.xlu1 %v367_v14 }
 0x340   :  { %v374_v1 = vpop.xlane.xlu1 %373 }
 0x341   :  { %v377_v17 = vsub.f32 %v359_v11, %v374_v1  ;;  %v378_v3 = vsub.f32 %v361_v12, %v374_v1 }
 0x343   :  { %v383_v18 = vmul.f32 1.442695, %v377_v17  ;;  %v385_v19 = vmul.f32 1.442695, %v378_v3 }
 0x344   :  { %v369_v20 = vpop.xlane.xlu1 %368 }
 0x345   :  { %641 = vpow2.f32 %v383_v18  ;;  %v375_v21 = vsub.f32 %v286_v6, %v369_v20  ;;  %v376_v22 = vsub.f32 %v288_v9, %v369_v20 }
 0x346   :  { %643 = vpow2.f32 %v385_v19 }
 0x347   :  { %v379_v23 = vmul.f32 1.442695, %v375_v21  ;;  %v381_v24 = vmul.f32 1.442695, %v376_v22 }
 0x349   :  { %645 = vpow2.f32 %v379_v23 }
 0x34a   :  { %647 = vpow2.f32 %v381_v24 }
 0x34f   :  { %v642_v25 = vpop.eup %641 }
 0x350   :  { %v644_v26 = vpop.eup %643  ;;  %v392_v27 = vsel %vm364_vm3, %v642_v25, 0.0 }
 0x351   :  { %531 = vmatprep.mubr.f32.mxu0 %v644_v26  ;;  %v393_v28 = vsel %vm364_vm3, %v644_v26, 0.0 }
 0x352   :  { %532 = vmatmul.mubr.f32.vlgmr.msra.gmra.mrb[4].mxu0 %v642_v25  ;;  %v394_v29 = vadd.f32 %v393_v28, %v392_v27 }
 0x353   :  { %v646_v30 = vpop.eup %645 }
 0x354   :  { %v648_v31 = vpop.eup %647  ;;  %395 = vadd.xlane.f32.xlu0 %v394_v29  ;;  %v387_v32 = vsel %vm364_vm3, %v646_v30, 0.0 }
 0x355   :  { %461 = vmatprep.mubr.f32.mxu1 %v648_v31  ;;  %v388_v33 = vsel %vm364_vm3, %v648_v31, 0.0 }
 0x356   :  { %462 = vmatmul.mubr.f32.vlgmr.msra.gmra.mrb[2].mxu1 %v646_v30  ;;  %v389_v34 = vadd.f32 %v388_v33, %v387_v32 }
 0x358   :  { %390 = vadd.xlane.f32.xlu1 %v389_v34 }
 0x3e1   :  { %v396_v35 = vpop.xlane.xlu0 %395 }
 0x3e2   :  { %649 = vrcp.f32 %v396_v35 }
 0x3e5   :  { %v391_v36 = vpop.xlane.xlu1 %390 }
 0x3e6   :  { %651 = vrcp.f32 %v391_v36 }
 0x3ec   :  { %v650_v38 = vpop.eup %649 }
 0x3ed   :  { %v546_v39 = vrot.slane %v650_v38, %v541_v37 }
 0x3f0   :  { %v652_v40 = vpop.eup %651 }
 0x3f1   :  { %v542_v45 = vrot.slane %v652_v40, %v541_v37 }
 0x425   :  { %v533_v41 = vpop.f32.mrb[4].mxu0 }
 0x426   :  { %v548_v42 = vmul.f32 %v546_v39, %v533_v41  ;;  %v535_v43 = vpop.f32.mrb[5].mxu0 }
 0x428   :  { %v550_v44 = vmul.f32 %v548_v42, %v548_v42 }
 0x429   :  { %v463_v46 = vpop.f32.mrb[2].mxu1 }
 0x42a   :  { %v552_v47 = vmul.f32 %v550_v44, %v550_v44  ;;  %v547_v48 = vmul.f32 %v542_v45, %v463_v46  ;;  %v465_v50 = vpop.f32.mrb[3].mxu1 }
 0x42c   :  { %v549_v51 = vmul.f32 %v547_v48, %v547_v48  ;;  %v555_v52 = vrot.slane %v552_v47, 7 }
 0x42e   :  { %v551_v53 = vmul.f32 %v549_v51, %v549_v51 }
 0x430   :  { %v556_v54 = vsel %vm119_vm1, %v555_v52, %v551_v53 }
 0x431   :  { %v559_v49 = vsel %vm558_vm4, %v556_v54, 0.0 }
 0x432   :  { %560 = vadd.xlane.f32.xlu0 %v559_v49 }
 0x4bf   :  { %v561_v55 = vpop.xlane.xlu0 %560 }
 0x4c0   :  { %v562_v56 = vmax.f32 %v561_v55, 1e-24 }
 0x4c2   :  { %653 = vrsqrt.f32 %v562_v56 }
 0x4cc   :  { %v654_v57 = vpop.eup %653 }
 0x4cd   :  { %v565_v58 = vrot.slane %v654_v57, 1  ;;  %v568_v60 = vmul.f32 %v654_v57, %v549_v51 }
 0x4cf   :  { %v569_v59 = vmul.f32 %v565_v58, %v550_v44 }
 0x4d1   :  { %v572_v61 = vrot.slane %v569_v59, 7 }
 0x4d3   :  { %v573_v62 = vsel %vm119_vm1, %v572_v61, %v568_v60 }
 0x4d4   :  { %575 = vst.msk [vmem:[#allocation8] sm:$0x3] %vm558_vm4, %v573_v62 }
 0x4d5   :  { %710 = shalt.err (!%p707_p6)
}
 0x4d6   :  { %s711_s25 = scalar_lea.hbm %s844_s4, 32 }
 0x4d7   :  { %p712_p7 = scmp.ne.s32.totalorder %s844_s4, %s711_s25  ;;  %p715_p8 = scmp.lt.u32.totalorder %s711_s25, %s844_s4 }
 0x4d9   :  { %p717_p9 = pnand %p715_p8, %p712_p7 }
 0x4db   :  { %720 = shalt.err (!%p717_p9)
}
 0x4dc   :  { %585 = dma.vmem_to_hbm [thread:$0]  %s583_s21, 32, %s844_s4, [#allocation5]  }
 0x4dd   :  { %725 = dma.done.wait [#allocation5], 32  }
 0x4de   :  { %726 = vsyncadd [#allocation5], 4294967264 }
 0x4df   :  { %589 = vsyncpa [#allocation4], 1 }
 0x4e0   :  { %590 = vsyncpa [#allocation7], 1 }
 0x4e1   :  { %591 = vsyncpa [#allocation5], 1 }

</bundles_post_ra>
